<compile_context>
chip_gen: v6e
topology: v6e:2x2x1
jax: 0.10.0
libtpu: 0.0.40
codegen_flags: <defaults>
</compile_context>

<pallas_src>
import functools

import jax
import jax.numpy as jnp
import numpy as np
from jax.experimental import pallas as pl
from jax.experimental.pallas import tpu as pltpu

LANE = 128  # TPU lane width; final output channel dim is zero-padded to this.


# ---------------------------------------------------------------------------
# Fused two-layer encoder kernel (per batch element)
# ---------------------------------------------------------------------------
def _fused_encoder_kernel(p1_ref, w1_ref, b1_ref, sel_ref, w2_ref, b2_ref, o_ref):
    # ---- layer 1: im2col-patches @ W1 + b1, ReLU (stays resident) ----------
    #   p1: (M1, K1)   w1: (K1, C1)   -> y1: (M1, C1)
    y1 = jnp.dot(p1_ref[...], w1_ref[...], preferred_element_type=jnp.float32)
    y1 = jnp.maximum(y1 + b1_ref[...], 0.0)

    # ---- layer 2: 3x3/stride-2 conv as 9 tap matmuls on resident y1 --------
    #   sel[t]: (M2, M1) 0/1 row-gather for tap t (zero rows = SAME padding)
    #   w2[t] : (C1, 128) tap weights, zero-padded to a full lane width
    acc = jnp.zeros(o_ref.shape, jnp.float32)
    for t in range(sel_ref.shape[0]):                     # static unroll (9)
        g = jnp.dot(sel_ref[t], y1, preferred_element_type=jnp.float32)
        acc = acc + jnp.dot(g, w2_ref[t], preferred_element_type=jnp.float32)

    # lane-dense (M2, 128) store; real channels sliced off in the wrapper.
    o_ref[...] = jnp.maximum(acc + b2_ref[...], 0.0).astype(o_ref.dtype)


def _fused_encoder(patches1, w1_mat, b1_row, sel, w2_taps, b2_pad):
    """patches1: (N, M1, K1) -> (N, M2, 128) fused conv1+conv2 (+bias,+ReLU)."""
    n, m1, k1 = patches1.shape
    n_taps, m2, _ = sel.shape
    c1 = w1_mat.shape[1]
    npad = w2_taps.shape[-1]
    return pl.pallas_call(
        _fused_encoder_kernel,
        out_shape=jax.ShapeDtypeStruct((n, m2, npad), jnp.float32),
        grid=(n,),
        in_specs=[
            # per-batch patch tile (auto double-buffered across the grid)
            pl.BlockSpec((None, m1, k1), lambda b: (b, 0, 0)),
            # weights / bias / selectors: resident (same block every step)
            pl.BlockSpec((k1, c1), lambda b: (0, 0)),
            pl.BlockSpec((1, c1), lambda b: (0, 0)),
            pl.BlockSpec((n_taps, m2, m1), lambda b: (0, 0, 0)),
            pl.BlockSpec((n_taps, c1, npad), lambda b: (0, 0, 0)),
            pl.BlockSpec((1, npad), lambda b: (0, 0)),
        ],
        out_specs=pl.BlockSpec((None, m2, npad), lambda b: (b, 0, 0)),
        compiler_params=pltpu.CompilerParams(
            dimension_semantics=("parallel",),       # 2 TCs on v7x; loop elsewhere
            vmem_limit_bytes=32 * 1024 * 1024),      # explicit; safe on v5e/v6e/v7x
    )(patches1, w1_mat, b1_row, sel, w2_taps, b2_pad)


# ---------------------------------------------------------------------------
# Host-side glue (runs under one jax.jit)
# ---------------------------------------------------------------------------
def _im2col(x_nhwc, k, stride, pad):
    """NHWC -> (n, ho*wo, k*k*c) patches, column order (kh, kw, cin)."""
    x = jnp.pad(x_nhwc, ((0, 0), (pad, pad), (pad, pad), (0, 0)))
    n, hp, wp, c = x.shape
    ho = (hp - k) // stride + 1
    wo = (wp - k) // stride + 1
    cols = []
    for i in range(k):
        for j in range(k):
            cols.append(x[:, i:i + (ho - 1) * stride + 1:stride,
                            j:j + (wo - 1) * stride + 1:stride, :])
    patches = jnp.concatenate(cols, axis=-1)          # (n, ho, wo, k*k*c)
    return patches.reshape(n, ho * wo, k * k * c), ho, wo


@functools.lru_cache(maxsize=None)
def _build_tap_selectors(h_in, w_in, k, stride, pad):
    """(k*k, h_out*w_out, h_in*w_in) 0/1 selection matrices for the 2nd conv.

    sel[t, r_out, r_in] = 1 iff output position r_out reads input position
    r_in for kernel tap t; out-of-bounds taps (SAME padding) give zero rows.
    Trace-time constant -- lets the fused kernel do conv-2's im2col with MXU
    matmuls only.
    """
    h_out = (h_in + 2 * pad - k) // stride + 1
    w_out = (w_in + 2 * pad - k) // stride + 1
    sel = np.zeros((k * k, h_out * w_out, h_in * w_in), np.float32)
    for i in range(k):
        for j in range(k):
            t = i * k + j
            for ho in range(h_out):
                for wo in range(w_out):
                    h = stride * ho + i - pad
                    w = stride * wo + j - pad
                    if 0 <= h < h_in and 0 <= w < w_in:
                        sel[t, ho * w_out + wo, h * w_in + w] = 1.0
    return sel


def _encoder_forward(params, x_nchw, *, k, stride, pad, cout2):
    n = x_nchw.shape[0]
    x_nhwc = jnp.transpose(x_nchw, (0, 2, 3, 1)).astype(jnp.float32)
    patches1, h1, w1 = _im2col(x_nhwc, k, stride, pad)          # (n, M1, K1)
    sel = jnp.asarray(_build_tap_selectors(h1, w1, k, stride, pad))
    h2 = (h1 + 2 * pad - k) // stride + 1
    w2 = (w1 + 2 * pad - k) // stride + 1
    out_pad = _fused_encoder(patches1, params["w1_mat"], params["b1_row"],
                             sel, params["w2_taps"], params["b2_pad"])
    out = out_pad[:, :, :cout2]                                  # drop lane padding
    out = out.reshape(n, h2, w2, cout2)
    return jnp.transpose(out, (0, 3, 1, 2))                      # back to NCHW


# ---------------------------------------------------------------------------
# ConvAutoencoder
# ---------------------------------------------------------------------------
class ConvAutoencoderPallas:
    """forward(x) = encoder(x); reverse(x) = decoder(x) (encoder path shown)."""

    def __init__(self, key):
        k1, k2, k3, k4 = jax.random.split(key, 4)
        self.w1 = 0.1 * jax.random.normal(k1, (8, 4, 3, 3), jnp.float32)
        self.b1 = 0.1 * jax.random.normal(k2, (8,), jnp.float32)
        self.w2 = 0.1 * jax.random.normal(k3, (16, 8, 3, 3), jnp.float32)
        self.b2 = 0.1 * jax.random.normal(k4, (16,), jnp.float32)
        # TODO(synk): decoder (ConvTranspose2d) / reverse() path of the
        # autoencoder is not exercised by forward(); only the encoder is here.

        cout1, cin1, kh, kw = self.w1.shape
        cout2, cin2, _, _ = self.w2.shape
        assert kh == kw

        # --- hoisted kernel-ready parameter layouts (computed once) ---------
        # layer-1 weight matrix, column order (kh, kw, cin) matches im2col
        w1_mat = jnp.transpose(self.w1, (2, 3, 1, 0)).reshape(kh * kw * cin1, cout1)
        # layer-2 per-tap weights (kh*kw, cin, cout), lane-padded to 128
        w2_taps = jnp.transpose(self.w2, (2, 3, 1, 0)).reshape(kh * kw, cin2, cout2)
        w2_taps = jnp.pad(w2_taps, ((0, 0), (0, 0), (0, LANE - cout2)))
        b2_pad = jnp.pad(self.b2.reshape(1, cout2), ((0, 0), (0, LANE - cout2)))
        self.params = {
            "w1_mat": w1_mat.astype(jnp.float32),
            "b1_row": self.b1.reshape(1, cout1).astype(jnp.float32),
            "w2_taps": w2_taps.astype(jnp.float32),
            "b2_pad": b2_pad.astype(jnp.float32),
        }

        self._fwd = jax.jit(functools.partial(
            _encoder_forward, k=kh, stride=2, pad=1, cout2=cout2))

    def forward(self, x_nchw):
        return self._fwd(self.params, x_nchw)


def _reference_forward(model, x_nchw):
    """Pure-JAX reference (lax conv) for correctness check."""
    def conv(x, w, b, stride, pad):
        y = jax.lax.conv_general_dilated(
            x, w, window_strides=(stride, stride),
            padding=((pad, pad), (pad, pad)),
            dimension_numbers=("NCHW", "OIHW", "NCHW"))
        return jnp.maximum(y + b.reshape(1, -1, 1, 1), 0.0)
    h = conv(x_nchw, model.w1, model.b1, 2, 1)
    return conv(h, model.w2, model.b2, 2, 1)


if __name__ == "__main__":
    key = jax.random.PRNGKey(0)
    kx, kp = jax.random.split(key)
    x = jax.random.normal(kx, (2, 4, 16, 16), jnp.float32)   # NCHW, like PyTorch

    model = ConvAutoencoderPallas(kp)
    out = jax.block_until_ready(model.forward(x))
    assert out.shape == (2, 16, 4, 4), out.shape

    ref = jax.block_until_ready(_reference_forward(model, x))
    assert jnp.allclose(out, ref, atol=1e-4, rtol=1e-4), \
        float(jnp.max(jnp.abs(out - ref)))

    print("KERNEL_OK")
</pallas_src>

<mosaic_0001>
module attributes {stable_mosaic.version = 11 : i64} {
  func.func @_fused_encoder_kernel(%arg0: i32, %arg1: memref<1x64x36xf32, #tpu.memory_space<vmem>>, %arg2: memref<36x8xf32, #tpu.memory_space<vmem>>, %arg3: memref<1x8xf32, #tpu.memory_space<vmem>>, %arg4: memref<9x16x64xf32, #tpu.memory_space<vmem>>, %arg5: memref<9x8x128xf32, #tpu.memory_space<vmem>>, %arg6: memref<1x128xf32, #tpu.memory_space<vmem>>, %arg7: memref<1x16x128xf32, #tpu.memory_space<vmem>>) attributes {dimension_semantics = [#tpu.dimension_semantics<parallel>], iteration_bounds = array<i64: 2>, scalar_prefetch = 0 : i64, scratch_operands = 0 : i64, tpu.core_type = #tpu.core_type<tc>, window_params = [{transform_indices = @transform_0, window_bounds = array<i64: 1, 64, 36>}, {pipeline_mode = #tpu.pipeline_mode<synchronous>, transform_indices = @transform_1, window_bounds = array<i64: 36, 8>}, {pipeline_mode = #tpu.pipeline_mode<synchronous>, transform_indices = @transform_2, window_bounds = array<i64: 1, 8>}, {pipeline_mode = #tpu.pipeline_mode<synchronous>, transform_indices = @transform_3, window_bounds = array<i64: 9, 16, 64>}, {pipeline_mode = #tpu.pipeline_mode<synchronous>, transform_indices = @transform_4, window_bounds = array<i64: 9, 8, 128>}, {pipeline_mode = #tpu.pipeline_mode<synchronous>, transform_indices = @transform_5, window_bounds = array<i64: 1, 128>}, {transform_indices = @transform_6, window_bounds = array<i64: 1, 16, 128>}]} {
    %c0 = arith.constant 0 : index
    %c0_0 = arith.constant 0 : index
    %c0_1 = arith.constant 0 : index
    %0 = vector.load %arg1[%c0, %c0_0, %c0_1] : memref<1x64x36xf32, #tpu.memory_space<vmem>>, vector<1x64x36xf32>
    %1 = vector.shape_cast %0 : vector<1x64x36xf32> to vector<64x36xf32>
    %c0_2 = arith.constant 0 : index
    %c0_3 = arith.constant 0 : index
    %2 = vector.load %arg2[%c0_2, %c0_3] : memref<36x8xf32, #tpu.memory_space<vmem>>, vector<36x8xf32>
    %cst = arith.constant dense<0.000000e+00> : vector<64x8xf32>
    %3 = tpu.matmul %1, %2, %cst {dimension_numbers = #tpu.dot_dimension_numbers<[1], [0], [0], [1], [0, 0, 1, 1], [], []>} : vector<64x36xf32>, vector<36x8xf32>, vector<64x8xf32> -> vector<64x8xf32>
    %c0_4 = arith.constant 0 : index
    %c0_5 = arith.constant 0 : index
    %4 = vector.load %arg3[%c0_4, %c0_5] : memref<1x8xf32, #tpu.memory_space<vmem>>, vector<1x8xf32>
    %5 = vector.broadcast %4 : vector<1x8xf32> to vector<64x8xf32>
    %6 = arith.addf %3, %5 : vector<64x8xf32>
    %cst_6 = arith.constant 0.000000e+00 : f32
    %7 = vector.broadcast %cst_6 : f32 to vector<64x8xf32>
    %8 = arith.maximumf %6, %7 : vector<64x8xf32>
    %cst_7 = arith.constant 0.000000e+00 : f32
    %9 = vector.broadcast %cst_7 : f32 to vector<16x128xf32>
    %c0_8 = arith.constant 0 : index
    %c0_9 = arith.constant 0 : index
    %c0_10 = arith.constant 0 : index
    %10 = vector.load %arg4[%c0_8, %c0_9, %c0_10] : memref<9x16x64xf32, #tpu.memory_space<vmem>>, vector<1x16x64xf32>
    %11 = vector.shape_cast %10 : vector<1x16x64xf32> to vector<16x64xf32>
    %cst_11 = arith.constant dense<0.000000e+00> : vector<16x8xf32>
    %12 = tpu.matmul %11, %8, %cst_11 {dimension_numbers = #tpu.dot_dimension_numbers<[1], [0], [0], [1], [0, 0, 1, 1], [], []>} : vector<16x64xf32>, vector<64x8xf32>, vector<16x8xf32> -> vector<16x8xf32>
    %c0_12 = arith.constant 0 : index
    %c0_13 = arith.constant 0 : index
    %c0_14 = arith.constant 0 : index
    %13 = vector.load %arg5[%c0_12, %c0_13, %c0_14] : memref<9x8x128xf32, #tpu.memory_space<vmem>>, vector<1x8x128xf32>
    %14 = vector.shape_cast %13 : vector<1x8x128xf32> to vector<8x128xf32>
    %cst_15 = arith.constant dense<0.000000e+00> : vector<16x128xf32>
    %15 = tpu.matmul %12, %14, %cst_15 {dimension_numbers = #tpu.dot_dimension_numbers<[1], [0], [0], [1], [0, 0, 1, 1], [], []>} : vector<16x8xf32>, vector<8x128xf32>, vector<16x128xf32> -> vector<16x128xf32>
    %16 = arith.addf %9, %15 : vector<16x128xf32>
    %c1 = arith.constant 1 : index
    %c0_16 = arith.constant 0 : index
    %c0_17 = arith.constant 0 : index
    %17 = vector.load %arg4[%c1, %c0_16, %c0_17] : memref<9x16x64xf32, #tpu.memory_space<vmem>>, vector<1x16x64xf32>
    %18 = vector.shape_cast %17 : vector<1x16x64xf32> to vector<16x64xf32>
    %cst_18 = arith.constant dense<0.000000e+00> : vector<16x8xf32>
    %19 = tpu.matmul %18, %8, %cst_18 {dimension_numbers = #tpu.dot_dimension_numbers<[1], [0], [0], [1], [0, 0, 1, 1], [], []>} : vector<16x64xf32>, vector<64x8xf32>, vector<16x8xf32> -> vector<16x8xf32>
    %c1_19 = arith.constant 1 : index
    %c0_20 = arith.constant 0 : index
    %c0_21 = arith.constant 0 : index
    %20 = vector.load %arg5[%c1_19, %c0_20, %c0_21] : memref<9x8x128xf32, #tpu.memory_space<vmem>>, vector<1x8x128xf32>
    %21 = vector.shape_cast %20 : vector<1x8x128xf32> to vector<8x128xf32>
    %cst_22 = arith.constant dense<0.000000e+00> : vector<16x128xf32>
    %22 = tpu.matmul %19, %21, %cst_22 {dimension_numbers = #tpu.dot_dimension_numbers<[1], [0], [0], [1], [0, 0, 1, 1], [], []>} : vector<16x8xf32>, vector<8x128xf32>, vector<16x128xf32> -> vector<16x128xf32>
    %23 = arith.addf %16, %22 : vector<16x128xf32>
    %c2 = arith.constant 2 : index
    %c0_23 = arith.constant 0 : index
    %c0_24 = arith.constant 0 : index
    %24 = vector.load %arg4[%c2, %c0_23, %c0_24] : memref<9x16x64xf32, #tpu.memory_space<vmem>>, vector<1x16x64xf32>
    %25 = vector.shape_cast %24 : vector<1x16x64xf32> to vector<16x64xf32>
    %cst_25 = arith.constant dense<0.000000e+00> : vector<16x8xf32>
    %26 = tpu.matmul %25, %8, %cst_25 {dimension_numbers = #tpu.dot_dimension_numbers<[1], [0], [0], [1], [0, 0, 1, 1], [], []>} : vector<16x64xf32>, vector<64x8xf32>, vector<16x8xf32> -> vector<16x8xf32>
    %c2_26 = arith.constant 2 : index
    %c0_27 = arith.constant 0 : index
    %c0_28 = arith.constant 0 : index
    %27 = vector.load %arg5[%c2_26, %c0_27, %c0_28] : memref<9x8x128xf32, #tpu.memory_space<vmem>>, vector<1x8x128xf32>
    %28 = vector.shape_cast %27 : vector<1x8x128xf32> to vector<8x128xf32>
    %cst_29 = arith.constant dense<0.000000e+00> : vector<16x128xf32>
    %29 = tpu.matmul %26, %28, %cst_29 {dimension_numbers = #tpu.dot_dimension_numbers<[1], [0], [0], [1], [0, 0, 1, 1], [], []>} : vector<16x8xf32>, vector<8x128xf32>, vector<16x128xf32> -> vector<16x128xf32>
    %30 = arith.addf %23, %29 : vector<16x128xf32>
    %c3 = arith.constant 3 : index
    %c0_30 = arith.constant 0 : index
    %c0_31 = arith.constant 0 : index
    %31 = vector.load %arg4[%c3, %c0_30, %c0_31] : memref<9x16x64xf32, #tpu.memory_space<vmem>>, vector<1x16x64xf32>
    %32 = vector.shape_cast %31 : vector<1x16x64xf32> to vector<16x64xf32>
    %cst_32 = arith.constant dense<0.000000e+00> : vector<16x8xf32>
    %33 = tpu.matmul %32, %8, %cst_32 {dimension_numbers = #tpu.dot_dimension_numbers<[1], [0], [0], [1], [0, 0, 1, 1], [], []>} : vector<16x64xf32>, vector<64x8xf32>, vector<16x8xf32> -> vector<16x8xf32>
    %c3_33 = arith.constant 3 : index
    %c0_34 = arith.constant 0 : index
    %c0_35 = arith.constant 0 : index
    %34 = vector.load %arg5[%c3_33, %c0_34, %c0_35] : memref<9x8x128xf32, #tpu.memory_space<vmem>>, vector<1x8x128xf32>
    %35 = vector.shape_cast %34 : vector<1x8x128xf32> to vector<8x128xf32>
    %cst_36 = arith.constant dense<0.000000e+00> : vector<16x128xf32>
    %36 = tpu.matmul %33, %35, %cst_36 {dimension_numbers = #tpu.dot_dimension_numbers<[1], [0], [0], [1], [0, 0, 1, 1], [], []>} : vector<16x8xf32>, vector<8x128xf32>, vector<16x128xf32> -> vector<16x128xf32>
    %37 = arith.addf %30, %36 : vector<16x128xf32>
    %c4 = arith.constant 4 : index
    %c0_37 = arith.constant 0 : index
    %c0_38 = arith.constant 0 : index
    %38 = vector.load %arg4[%c4, %c0_37, %c0_38] : memref<9x16x64xf32, #tpu.memory_space<vmem>>, vector<1x16x64xf32>
    %39 = vector.shape_cast %38 : vector<1x16x64xf32> to vector<16x64xf32>
    %cst_39 = arith.constant dense<0.000000e+00> : vector<16x8xf32>
    %40 = tpu.matmul %39, %8, %cst_39 {dimension_numbers = #tpu.dot_dimension_numbers<[1], [0], [0], [1], [0, 0, 1, 1], [], []>} : vector<16x64xf32>, vector<64x8xf32>, vector<16x8xf32> -> vector<16x8xf32>
    %c4_40 = arith.constant 4 : index
    %c0_41 = arith.constant 0 : index
    %c0_42 = arith.constant 0 : index
    %41 = vector.load %arg5[%c4_40, %c0_41, %c0_42] : memref<9x8x128xf32, #tpu.memory_space<vmem>>, vector<1x8x128xf32>
    %42 = vector.shape_cast %41 : vector<1x8x128xf32> to vector<8x128xf32>
    %cst_43 = arith.constant dense<0.000000e+00> : vector<16x128xf32>
    %43 = tpu.matmul %40, %42, %cst_43 {dimension_numbers = #tpu.dot_dimension_numbers<[1], [0], [0], [1], [0, 0, 1, 1], [], []>} : vector<16x8xf32>, vector<8x128xf32>, vector<16x128xf32> -> vector<16x128xf32>
    %44 = arith.addf %37, %43 : vector<16x128xf32>
    %c5 = arith.constant 5 : index
    %c0_44 = arith.constant 0 : index
    %c0_45 = arith.constant 0 : index
    %45 = vector.load %arg4[%c5, %c0_44, %c0_45] : memref<9x16x64xf32, #tpu.memory_space<vmem>>, vector<1x16x64xf32>
    %46 = vector.shape_cast %45 : vector<1x16x64xf32> to vector<16x64xf32>
    %cst_46 = arith.constant dense<0.000000e+00> : vector<16x8xf32>
    %47 = tpu.matmul %46, %8, %cst_46 {dimension_numbers = #tpu.dot_dimension_numbers<[1], [0], [0], [1], [0, 0, 1, 1], [], []>} : vector<16x64xf32>, vector<64x8xf32>, vector<16x8xf32> -> vector<16x8xf32>
    %c5_47 = arith.constant 5 : index
    %c0_48 = arith.constant 0 : index
    %c0_49 = arith.constant 0 : index
    %48 = vector.load %arg5[%c5_47, %c0_48, %c0_49] : memref<9x8x128xf32, #tpu.memory_space<vmem>>, vector<1x8x128xf32>
    %49 = vector.shape_cast %48 : vector<1x8x128xf32> to vector<8x128xf32>
    %cst_50 = arith.constant dense<0.000000e+00> : vector<16x128xf32>
    %50 = tpu.matmul %47, %49, %cst_50 {dimension_numbers = #tpu.dot_dimension_numbers<[1], [0], [0], [1], [0, 0, 1, 1], [], []>} : vector<16x8xf32>, vector<8x128xf32>, vector<16x128xf32> -> vector<16x128xf32>
    %51 = arith.addf %44, %50 : vector<16x128xf32>
    %c6 = arith.constant 6 : index
    %c0_51 = arith.constant 0 : index
    %c0_52 = arith.constant 0 : index
    %52 = vector.load %arg4[%c6, %c0_51, %c0_52] : memref<9x16x64xf32, #tpu.memory_space<vmem>>, vector<1x16x64xf32>
    %53 = vector.shape_cast %52 : vector<1x16x64xf32> to vector<16x64xf32>
    %cst_53 = arith.constant dense<0.000000e+00> : vector<16x8xf32>
    %54 = tpu.matmul %53, %8, %cst_53 {dimension_numbers = #tpu.dot_dimension_numbers<[1], [0], [0], [1], [0, 0, 1, 1], [], []>} : vector<16x64xf32>, vector<64x8xf32>, vector<16x8xf32> -> vector<16x8xf32>
    %c6_54 = arith.constant 6 : index
    %c0_55 = arith.constant 0 : index
    %c0_56 = arith.constant 0 : index
    %55 = vector.load %arg5[%c6_54, %c0_55, %c0_56] : memref<9x8x128xf32, #tpu.memory_space<vmem>>, vector<1x8x128xf32>
    %56 = vector.shape_cast %55 : vector<1x8x128xf32> to vector<8x128xf32>
    %cst_57 = arith.constant dense<0.000000e+00> : vector<16x128xf32>
    %57 = tpu.matmul %54, %56, %cst_57 {dimension_numbers = #tpu.dot_dimension_numbers<[1], [0], [0], [1], [0, 0, 1, 1], [], []>} : vector<16x8xf32>, vector<8x128xf32>, vector<16x128xf32> -> vector<16x128xf32>
    %58 = arith.addf %51, %57 : vector<16x128xf32>
    %c7 = arith.constant 7 : index
    %c0_58 = arith.constant 0 : index
    %c0_59 = arith.constant 0 : index
    %59 = vector.load %arg4[%c7, %c0_58, %c0_59] : memref<9x16x64xf32, #tpu.memory_space<vmem>>, vector<1x16x64xf32>
    %60 = vector.shape_cast %59 : vector<1x16x64xf32> to vector<16x64xf32>
    %cst_60 = arith.constant dense<0.000000e+00> : vector<16x8xf32>
    %61 = tpu.matmul %60, %8, %cst_60 {dimension_numbers = #tpu.dot_dimension_numbers<[1], [0], [0], [1], [0, 0, 1, 1], [], []>} : vector<16x64xf32>, vector<64x8xf32>, vector<16x8xf32> -> vector<16x8xf32>
    %c7_61 = arith.constant 7 : index
    %c0_62 = arith.constant 0 : index
    %c0_63 = arith.constant 0 : index
    %62 = vector.load %arg5[%c7_61, %c0_62, %c0_63] : memref<9x8x128xf32, #tpu.memory_space<vmem>>, vector<1x8x128xf32>
    %63 = vector.shape_cast %62 : vector<1x8x128xf32> to vector<8x128xf32>
    %cst_64 = arith.constant dense<0.000000e+00> : vector<16x128xf32>
    %64 = tpu.matmul %61, %63, %cst_64 {dimension_numbers = #tpu.dot_dimension_numbers<[1], [0], [0], [1], [0, 0, 1, 1], [], []>} : vector<16x8xf32>, vector<8x128xf32>, vector<16x128xf32> -> vector<16x128xf32>
    %65 = arith.addf %58, %64 : vector<16x128xf32>
    %c8 = arith.constant 8 : index
    %c0_65 = arith.constant 0 : index
    %c0_66 = arith.constant 0 : index
    %66 = vector.load %arg4[%c8, %c0_65, %c0_66] : memref<9x16x64xf32, #tpu.memory_space<vmem>>, vector<1x16x64xf32>
    %67 = vector.shape_cast %66 : vector<1x16x64xf32> to vector<16x64xf32>
    %cst_67 = arith.constant dense<0.000000e+00> : vector<16x8xf32>
    %68 = tpu.matmul %67, %8, %cst_67 {dimension_numbers = #tpu.dot_dimension_numbers<[1], [0], [0], [1], [0, 0, 1, 1], [], []>} : vector<16x64xf32>, vector<64x8xf32>, vector<16x8xf32> -> vector<16x8xf32>
    %c8_68 = arith.constant 8 : index
    %c0_69 = arith.constant 0 : index
    %c0_70 = arith.constant 0 : index
    %69 = vector.load %arg5[%c8_68, %c0_69, %c0_70] : memref<9x8x128xf32, #tpu.memory_space<vmem>>, vector<1x8x128xf32>
    %70 = vector.shape_cast %69 : vector<1x8x128xf32> to vector<8x128xf32>
    %cst_71 = arith.constant dense<0.000000e+00> : vector<16x128xf32>
    %71 = tpu.matmul %68, %70, %cst_71 {dimension_numbers = #tpu.dot_dimension_numbers<[1], [0], [0], [1], [0, 0, 1, 1], [], []>} : vector<16x8xf32>, vector<8x128xf32>, vector<16x128xf32> -> vector<16x128xf32>
    %72 = arith.addf %65, %71 : vector<16x128xf32>
    %c0_72 = arith.constant 0 : index
    %c0_73 = arith.constant 0 : index
    %73 = vector.load %arg6[%c0_72, %c0_73] : memref<1x128xf32, #tpu.memory_space<vmem>>, vector<1x128xf32>
    %74 = vector.broadcast %73 : vector<1x128xf32> to vector<16x128xf32>
    %75 = arith.addf %72, %74 : vector<16x128xf32>
    %cst_74 = arith.constant 0.000000e+00 : f32
    %76 = vector.broadcast %cst_74 : f32 to vector<16x128xf32>
    %77 = arith.maximumf %75, %76 : vector<16x128xf32>
    %c0_75 = arith.constant 0 : index
    %c0_76 = arith.constant 0 : index
    %c0_77 = arith.constant 0 : index
    %78 = vector.load %arg7[%c0_75, %c0_76, %c0_77] : memref<1x16x128xf32, #tpu.memory_space<vmem>>, vector<1x16x128xf32>
    %79 = vector.shape_cast %78 : vector<1x16x128xf32> to vector<16x128xf32>
    %80 = vector.shape_cast %77 : vector<16x128xf32> to vector<1x16x128xf32>
    tpu.vector_store %arg7[%c0_75, %c0_76, %c0_77], %80 {strides = array<i32>} : memref<1x16x128xf32, #tpu.memory_space<vmem>>, vector<1x16x128xf32>,
    return
  }
  func.func @transform_0(%arg0: i32) -> (i32, i32, i32) {
    %c0_i32 = arith.constant 0 : i32
    %c0_i32_0 = arith.constant 0 : i32
    %c0_i32_1 = arith.constant 0 : i32
    return %arg0, %c0_i32, %c0_i32_0 : i32, i32, i32
  }
  func.func @transform_1(%arg0: i32) -> (i32, i32) {
    %c0_i32 = arith.constant 0 : i32
    %c0_i32_0 = arith.constant 0 : i32
    %c0_i32_1 = arith.constant 0 : i32
    return %c0_i32, %c0_i32_0 : i32, i32
  }
  func.func @transform_2(%arg0: i32) -> (i32, i32) {
    %c0_i32 = arith.constant 0 : i32
    %c0_i32_0 = arith.constant 0 : i32
    %c0_i32_1 = arith.constant 0 : i32
    return %c0_i32, %c0_i32_0 : i32, i32
  }
  func.func @transform_3(%arg0: i32) -> (i32, i32, i32) {
    %c0_i32 = arith.constant 0 : i32
    %c0_i32_0 = arith.constant 0 : i32
    %c0_i32_1 = arith.constant 0 : i32
    %c0_i32_2 = arith.constant 0 : i32
    return %c0_i32, %c0_i32_0, %c0_i32_1 : i32, i32, i32
  }
  func.func @transform_4(%arg0: i32) -> (i32, i32, i32) {
    %c0_i32 = arith.constant 0 : i32
    %c0_i32_0 = arith.constant 0 : i32
    %c0_i32_1 = arith.constant 0 : i32
    %c0_i32_2 = arith.constant 0 : i32
    return %c0_i32, %c0_i32_0, %c0_i32_1 : i32, i32, i32
  }
  func.func @transform_5(%arg0: i32) -> (i32, i32) {
    %c0_i32 = arith.constant 0 : i32
    %c0_i32_0 = arith.constant 0 : i32
    %c0_i32_1 = arith.constant 0 : i32
    return %c0_i32, %c0_i32_0 : i32, i32
  }
  func.func @transform_6(%arg0: i32) -> (i32, i32, i32) {
    %c0_i32 = arith.constant 0 : i32
    %c0_i32_0 = arith.constant 0 : i32
    %c0_i32_1 = arith.constant 0 : i32
    return %arg0, %c0_i32, %c0_i32_0 : i32, i32, i32
  }
}

</mosaic_0001>

<bundles_post_ra>
// kernel: _encoder_forward.1
= control target key start
LH: loop header
LB: loop body
LE: loop exit
PB: predicated region body
PF: predicated region fallthrough
CT: control target
= control target key end

     0   :  { %11 = vsyncpa [#allocation3], 0  ;;  %s3020_s0 = inlined_call_operand.vmem [shape: f32[2,64,36], index: 0, kind: input, shape index: {}]   ;;  %s3021_s1 = inlined_call_operand.vmem [shape: f32[36,8], index: 1, kind: input, shape index: {}]   ;;  %s3022_s2 = inlined_call_operand.vmem [shape: f32[1,8], index: 2, kind: input, shape index: {}]   ;;  %s3023_s3 = inlined_call_operand.vmem [shape: f32[9,16,64], index: 3, kind: input, shape index: {}]   ;;  %s3024_s4 = inlined_call_operand.vmem [shape: f32[9,8,128], index: 4, kind: input, shape index: {}]   ;;  %s3025_s5 = inlined_call_operand.vmem [shape: f32[1,128], index: 5, kind: input, shape index: {}]   ;;  %s3026_s6 = inlined_call_operand.hbm [shape: f32[2,16,128], index: 6, kind: output, shape index: {}]  }
   0x1   :  { %13 = vsyncpa [#allocation3 + $0x1], 0  ;;  %s2612_s21 = smov 0   ;;  %s2614_s22 = smov 0  }
   0x2   :  { %s2616_s23 = smov 0   ;;  %s2618_s24 = smov 0  }
   0x3 LB: > { %s2633_s25 = sadd.s32 4294967295, %s2572_s24   ;;  %s2018_s26 = sadd.s32 4294967294, %s2572_s24   ;;  %s2572_s24 = sphi %s2618_s24, %s3032_s24   ;;  %s2568_s23 = sphi %s2616_s23, %s3031_s23   ;;  %s2564_s22 = sphi %s2614_s22, %s3030_s22   ;;  %s2560_s21 = sphi %s2612_s21, %s3029_s21  }
   0x4   : > { %s2637_s27 = sadd.s32 1, %s2572_s24   ;;  %s157_s28 = sadd.s32 1, %s2568_s23 }
   0x5   : > { %s154_s29 = ssub.s32 %s2572_s24, %s2637_s27  ;;  %p167_p0 = scmp.ne.s32.totalorder %s2568_s23, %s2564_s22 }
   0x6   : > { %p155_p1 = scmp.eq.s32.totalorder %s154_s29, 0  ;;  %p168_p2 = scmp.eq.s32.totalorder %s2633_s25, 1 }
   0x7   : > { %p173_p3 = scmp.ne.s32.totalorder %s2564_s22, %s2560_s21  ;;  %p174_p4 = scmp.eq.s32.totalorder %s2018_s26, 1 }
   0x8   : > { %s2648_s30 = scalar_select %p155_p1, %s2568_s23, %s157_s28  }
   0x9   : > { %p2650_p5 = por %p168_p2, %p167_p0  ;;  %p2654_p6 = por %p174_p4, %p173_p3 }
   0xa   : > { %p2021_p7 = scmp.ge.s32.totalorder %s2572_s24, 1  ;;  %p215_p8 = scmp.lt.s32.totalorder %s2572_s24, 3 }
   0xc   : > { %p216_p9 = pnand %p2021_p7, %p215_p8 }
   0xd   : > { %p245_p10 = scmp.lt.s32.totalorder (!%p216_p9), %s2633_s25, 1  ;;  %s242_s20 = sand.u32 (!%p216_p9), 1, %s2564_s22  }
   0xe   : > { %219 = sbr.rel (%p216_p9) target bundleno = 2150 (0x866), region = 44  ;;  %s2102_s11 = sshll.u32 (!%p216_p9), %s2633_s25, 8 }
   0xf   : > { %s2978_s14 = scalar_lea.hbm (!%p216_p9), %s3026_s6, %s2102_s11 }
  0x13   : > { %v262_v0 = vld [vmem:[%s3021_s1 + $0x20] sm:$0xf]  ;;  %vm295_vm0 = vcmask 1043456   ;;  %v261_v1 = vld [vmem:[%s3021_s1 + $0x18] sm:$0xff]  ;;  %v260_v2 = vld [vmem:[%s3021_s1 + $0x10] sm:$0xff]  ;;  %s246_s15 = scalar_select %p245_p10, %s2633_s25, 1 }
  0x14   : > { %2233 = vmatprep.subr.msk.mxu0 %vm295_vm0, %v262_v0  ;;  %v259_v3 = vld [vmem:[%s3021_s1 + $0x8] sm:$0xff]  ;;  %vm270_vm1 = vcmask 293888   ;;  %v258_v4 = vld [vmem:[%s3021_s1] sm:$0xff]  ;;  %vm414_vm2 = vcmask 523264   ;;  %v2037_v14 = vld [vmem:[%s3023_s3 + $0x10] sm:$0xff]  ;;  %vm583_vm3 = vcmask 64512  }
  0x15   : > { %2234 = vmatpush3.msk.msra.mxu0 %vm295_vm0, %v262_v0  ;;  %s2101_s18 = sshll.u32 %s246_s15, 6  ;;  %v412_v13 = vld [vmem:[%s3023_s3] sm:$0xff]  ;;  %v413_v40 = vld [vmem:[%s3023_s3 + $0x8] sm:$0xff]  ;;  %v2038_v41 = vld [vmem:[%s3023_s3 + $0x18] sm:$0xff]  ;;  %s2980_s15 = scalar_lea.sflag [#allocation3], %s242_s20 }
  0x16   : > { %2235 = vmatprep.subr.mxu0 %v261_v1  ;;  %s249_s26 = scalar_lea.vmem %s3020_s0, %s2101_s18  ;;  %2271 = vmatprep.mubr.msk.f32.mxu1 %vm414_vm2, %v412_v13  ;;  %v2025_v21 = vld [vmem:[%s3022_s2] ss:$0 sm:$0xff]  ;;  %v2041_v43 = vld [vmem:[%s3024_s4 + $0x8] sm:$0xff]  ;;  %v2050_v44 = vld [vmem:[%s3024_s4 + $0x10] sm:$0xff]  ;;  %s2574_s25 = smov [#allocation2]  }
  0x17   : > { %2236 = vmatpush3.msra.mxu0 %v261_v1  ;;  %v250_v5 = vld [vmem:[%s249_s26] sm:$0xff]  ;;  %v251_v6 = vld [vmem:[%s249_s26 + $0x8] sm:$0xff]  ;;  %v252_v7 = vld [vmem:[%s249_s26 + $0x10] sm:$0xff]  ;;  %s2516_s17 = sshll.u32 %s2574_s25, 4  ;;  %s2517_s17 = int_to_ptr.vmem [resolvable:$false] %s2516_s17 }
  0x18   : > { %2237 = vmatprep.subr.mxu0 %v260_v2  ;;  %2243 = vmatprep.mubr.msk.f32.mxu0 %vm270_vm1, %v250_v5  ;;  %v253_v8 = vld [vmem:[%s249_s26 + $0x18] sm:$0xff]  ;;  %v254_v9 = vld [vmem:[%s249_s26 + $0x20] sm:$0xff]  ;;  %v255_v10 = vld [vmem:[%s249_s26 + $0x28] sm:$0xff]  ;;  %s2518_s18 = scalar_lea.vmem %s2517_s17, 512 }
  0x19   : > { %2238 = vmatpush3.msra.mxu0 %v260_v2  ;;  %v256_v11 = vld [vmem:[%s249_s26 + $0x30] sm:$0xff]  ;;  %v257_v12 = vld [vmem:[%s249_s26 + $0x38] sm:$0xff]  ;;  %v496_v42 = vld [vmem:[%s3024_s4] sm:$0xff]  ;;  %s2022_s26 = sshll.u32 %s242_s20, 4 }
  0x1a   : > { %2239 = vmatprep.subr.mxu0 %v259_v3  ;;  %v2046_v49 = vld [vmem:[%s3023_s3 + $0x20] sm:$0xff]  ;;  %v2047_v50 = vld [vmem:[%s3023_s3 + $0x28] sm:$0xff]  ;;  %v2057_v51 = vld [vmem:[%s3024_s4 + $0x18] sm:$0xff]  ;;  %s244_s9 = scalar_lea.vmem [#allocation2], %s2022_s26 }
  0x1b   : > { %2240 = vmatpush3.msra.mxu0 %v259_v3  ;;  %v2053_v58 = vld [vmem:[%s3023_s3 + $0x30] sm:$0xff]  ;;  %v2054_v59 = vld [vmem:[%s3023_s3 + $0x38] sm:$0xff]  ;;  %v2064_v60 = vld [vmem:[%s3024_s4 + $0x20] sm:$0xff]  ;;  %s1956_s10 = sshll.u32 %s244_s9, 4  ;;  %s2973_s10 = int_to_ptr.vmem [resolvable:$true] %s1956_s10 }
  0x1c   : > { %2241 = vmatprep.subr.mxu0 %v258_v4  ;;  %v2060_v5 = vld [vmem:[%s3023_s3 + $0x40] sm:$0xff]  ;;  %s2512_s16 = scalar_lea.vmem %s2973_s10, 256  ;;  %p2519_p0 = scmp.lt.s32.totalorder %s2973_s10, %s2517_s17 }
  0x1d   : > { %2242 = vmatpush3.msra.mxu0 %v258_v4  ;;  %p2513_p11 = scmp.ne.s32.totalorder %s2973_s10, %s2512_s16  ;;  %p2520_p1 = scmp.lt.s32.totalorder %s2518_s18, %s2512_s16 }
  0x1e   : > { %2244 = vmatmul.mubr.msk.f32.vlgmr.msra.gmra.mxu0 %vm270_vm1, %v251_v6  ;;  %v2061_v6 = vld [vmem:[%s3023_s3 + $0x48] sm:$0xff] }
  0x1f   : > { %2246 = vmatprep.mubr.msk.f32.mxu0 %vm270_vm1, %v252_v7  ;;  %v2071_v7 = vld [vmem:[%s3024_s4 + $0x28] sm:$0xff]  ;;  %p2514_p12 = pnand %p2513_p11, %p2650_p5  ;;  %p2521_p2 = por %p2520_p1, %p2519_p0 }
  0x21   : > { %p2515_p13 = pneg %p2514_p12 }
  0x22   : > { %2247 = vmatmul.mubr.msk.f32.gmra.mxu0 %vm270_vm1, %v253_v8 }
  0x23   : > { %2249 = vmatprep.mubr.msk.f32.mxu0 %vm270_vm1, %v254_v9  ;;  %p2522_p3 = pnand %p2521_p2, %p2515_p13 }
  0x26   : > { %2250 = vmatmul.mubr.msk.f32.gmra.mxu0 %vm270_vm1, %v255_v10 }
  0x27   : > { %2252 = vmatprep.mubr.msk.f32.mxu0 %vm270_vm1, %v256_v11 }
  0x2a   : > { %2253 = vmatmul.mubr.msk.f32.gmra.mxu0 %vm270_vm1, %v257_v12 }
  0x2b   : > { %2290 = vmatprep.mubr.msk.f32.mxu0 %vm414_vm2, %v2037_v14  ;;  %v2067_v14 = vld [vmem:[%s3023_s3 + $0x50] sm:$0xff] }
  0xde   : > { %v2245_v15 = vpop.f32.mrf.mxu0 }
  0xdf   : > { %v371_v34 = vadd.f32 %v2245_v15, %v2025_v21  ;;  %v2068_v15 = vld [vmem:[%s3023_s3 + $0x58] sm:$0xff] }
  0xe0   : > { %v365_v16 = vpop.f32.mrf.mxu0 }
  0xe1   : > { %v366_v36 = vadd.f32 %v2025_v21, %v365_v16  ;;  %v2731_v38 = vmax.f32 %v371_v34, 0.0  ;;  %v2078_v16 = vld [vmem:[%s3024_s4 + $0x30] sm:$0xff] }
  0xe2   : > { %v2248_v17 = vpop.f32.mrf.mxu0 }
  0xe3   : > { %v381_v30 = vadd.f32 %v2248_v17, %v2025_v21  ;;  %v2737_v39 = vmax.f32 %v366_v36, 0.0 }
  0xe4   : > { %v375_v18 = vpop.f32.mrf.mxu0 }
  0xe5   : > { %v376_v32 = vadd.f32 %v2025_v21, %v375_v18  ;;  %v2719_v35 = vmax.f32 %v381_v30, 0.0 }
  0xe6   : > { %v2251_v19 = vpop.f32.mrf.mxu0 }
  0xe7   : > { %v391_v25 = vadd.f32 %v2251_v19, %v2025_v21  ;;  %v2725_v37 = vmax.f32 %v376_v32, 0.0 }
  0xe8   : > { %v385_v20 = vpop.f32.mrf.mxu0 }
  0xe9   : > { %v386_v28 = vadd.f32 %v2025_v21, %v385_v20  ;;  %v2707_v31 = vmax.f32 %v391_v25, 0.0  ;;  %v2085_v25 = vld [vmem:[%s3024_s4 + $0x38] sm:$0xff] }
  0xea   : > { %v2254_v22 = vpop.f32.mrf.mxu0 }
  0xeb   : > { %v401_v23 = vadd.f32 %v2254_v22, %v2025_v21  ;;  %v2713_v33 = vmax.f32 %v386_v28, 0.0 }
  0xec   : > { %v395_v24 = vpop.f32.mrf.mxu0 }
  0xed   : > { %v2699_v26 = vmax.f32 %v401_v23, 0.0  ;;  %v396_v27 = vadd.f32 %v2025_v21, %v395_v24  ;;  %v2074_v23 = vld [vmem:[%s3023_s3 + $0x60] sm:$0xff]  ;;  %v2075_v24 = vld [vmem:[%s3023_s3 + $0x68] sm:$0xff] }
  0xef   : > { %v2701_v29 = vmax.f32 %v396_v27, 0.0  ;;  %2255 = vmatprep.subr.mxu1 %v2699_v26  ;;  %2274 = vmatprep.subr.mxu0 %v2699_v26 }
  0xf0   : > { %2256 = vmatpush3.msra.mxu1 %v2699_v26  ;;  %2275 = vmatpush3.msra.mxu0 %v2699_v26 }
  0xf1   : > { %2257 = vmatprep.subr.mxu1 %v2701_v29  ;;  %2276 = vmatprep.subr.mxu0 %v2701_v29 }
  0xf2   : > { %2258 = vmatpush3.msra.mxu1 %v2701_v29  ;;  %2277 = vmatpush3.msra.mxu0 %v2701_v29 }
  0xf3   : > { %2259 = vmatprep.subr.mxu1 %v2707_v31  ;;  %2278 = vmatprep.subr.mxu0 %v2707_v31 }
  0xf4   : > { %2260 = vmatpush3.msra.mxu1 %v2707_v31  ;;  %2279 = vmatpush3.msra.mxu0 %v2707_v31 }
  0xf5   : > { %2261 = vmatprep.subr.mxu1 %v2713_v33  ;;  %2280 = vmatprep.subr.mxu0 %v2713_v33 }
  0xf6   : > { %2262 = vmatpush3.msra.mxu1 %v2713_v33  ;;  %2281 = vmatpush3.msra.mxu0 %v2713_v33 }
  0xf7   : > { %2263 = vmatprep.subr.mxu1 %v2719_v35  ;;  %2282 = vmatprep.subr.mxu0 %v2719_v35 }
  0xf8   : > { %2264 = vmatpush3.msra.mxu1 %v2719_v35  ;;  %2283 = vmatpush3.msra.mxu0 %v2719_v35 }
  0xf9   : > { %2265 = vmatprep.subr.mxu1 %v2725_v37  ;;  %2284 = vmatprep.subr.mxu0 %v2725_v37 }
  0xfa   : > { %2266 = vmatpush3.msra.mxu1 %v2725_v37  ;;  %2285 = vmatpush3.msra.mxu0 %v2725_v37 }
  0xfb   : > { %2267 = vmatprep.subr.mxu1 %v2731_v38  ;;  %2286 = vmatprep.subr.mxu0 %v2731_v38 }
  0xfc   : > { %2268 = vmatpush3.msra.mxu1 %v2731_v38  ;;  %2287 = vmatpush3.msra.mxu0 %v2731_v38 }
  0xfd   : > { %2269 = vmatprep.subr.mxu1 %v2737_v39  ;;  %2288 = vmatprep.subr.mxu0 %v2737_v39 }
  0xfe   : > { %2270 = vmatpush3.msra.mxu1 %v2737_v39  ;;  %2289 = vmatpush3.msra.mxu0 %v2737_v39 }
  0xff   : > { %2272 = vmatmul.mubr.msk.f32.vlgmr.msra.gmra.mxu1 %vm414_vm2, %v413_v40  ;;  %2291 = vmatmul.mubr.msk.f32.vlgmr.msra.gmra.mxu0 %vm414_vm2, %v2038_v41  ;;  %v2081_v40 = vld [vmem:[%s3023_s3 + $0x70] sm:$0xff]  ;;  %v2082_v41 = vld [vmem:[%s3023_s3 + $0x78] sm:$0xff] }
 0x100   : > { %2298 = vmatprep.subr.mxu1 %v496_v42  ;;  %2293 = vmatprep.subr.mxu0 %v2041_v43 }
 0x101   : > { %2299 = vmatpush3.msra.mxu1 %v496_v42  ;;  %2294 = vmatpush3.msra.mxu0 %v2041_v43 }
 0x102   : > { %2303 = vmatprep.subr.mxu1 %v2699_v26  ;;  %2322 = vmatprep.subr.mxu0 %v2050_v44 }
 0x1bf   : > { %v2273_v45 = vpop.f32.mrf.mxu1  ;;  %v2292_v46 = vpop.f32.mrf.mxu0 }
 0x1c1   : > { %v487_v47 = vpop.f32.mrf.mxu1  ;;  %v572_v48 = vpop.f32.mrf.mxu0 }
 0x1c2   : > { %2295 = vmatprep.mubr.msk.f32.mxu0 %vm583_vm3, %v572_v48  ;;  %2300 = vmatprep.mubr.msk.f32.mxu1 %vm583_vm3, %v487_v47  ;;  %v2088_v48 = vld [vmem:[%s3023_s3 + $0x80] sm:$0xff] }
 0x1c3   : > { %2296 = vmatmul.mubr.msk.f32.vlgmr.msra.gmra.mxu0 %vm583_vm3, %v2292_v46  ;;  %2301 = vmatmul.mubr.msk.f32.vlgmr.msra.gmra.mxu1 %vm583_vm3, %v2273_v45 }
 0x1c4   : > { %2304 = vmatpush3.msra.mxu1 %v2699_v26  ;;  %2323 = vmatpush3.msra.mxu0 %v2050_v44 }
 0x1c5   : > { %2305 = vmatprep.subr.mxu1 %v2701_v29  ;;  %2327 = vmatprep.subr.mxu0 %v2699_v26 }
 0x1c6   : > { %2306 = vmatpush3.msra.mxu1 %v2701_v29  ;;  %2319 = vmatprep.mubr.msk.f32.mxu1 %vm414_vm2, %v2046_v49 }
 0x1c7   : > { %2307 = vmatprep.subr.mxu1 %v2707_v31 }
 0x1c8   : > { %2308 = vmatpush3.msra.mxu1 %v2707_v31 }
 0x1c9   : > { %2309 = vmatprep.subr.mxu1 %v2713_v33 }
 0x1ca   : > { %2310 = vmatpush3.msra.mxu1 %v2713_v33 }
 0x1cb   : > { %2311 = vmatprep.subr.mxu1 %v2719_v35 }
 0x1cc   : > { %2312 = vmatpush3.msra.mxu1 %v2719_v35 }
 0x1cd   : > { %2313 = vmatprep.subr.mxu1 %v2725_v37 }
 0x1ce   : > { %2314 = vmatpush3.msra.mxu1 %v2725_v37 }
 0x1cf   : > { %2315 = vmatprep.subr.mxu1 %v2731_v38 }
 0x1d0   : > { %2316 = vmatpush3.msra.mxu1 %v2731_v38 }
 0x1d1   : > { %2317 = vmatprep.subr.mxu1 %v2737_v39 }
 0x1d2   : > { %2318 = vmatpush3.msra.mxu1 %v2737_v39 }
 0x1d3   : > { %2320 = vmatmul.mubr.msk.f32.vlgmr.msra.gmra.mxu1 %vm414_vm2, %v2047_v50  ;;  %2346 = vmatprep.subr.mxu1 %v2057_v51  ;;  %v2095_v50 = vld [vmem:[%s3025_s5] ss:$0 sm:$0xff] }
 0x1d4   : > { %2347 = vmatpush3.msra.mxu1 %v2057_v51 }
 0x1d5   : > { %2351 = vmatprep.subr.mxu1 %v2699_v26 }
 0x283   : > { %v2297_v52 = vpop.f32.mrf.mxu0  ;;  %v2302_v53 = vpop.f32.mrf.mxu1 }
 0x284   : > { %v743_v54 = vadd.f32 %v2302_v53, %v2297_v52 }
 0x285   : > { %v737_v55 = vpop.f32.mrf.mxu1  ;;  %v656_v61 = vpop.f32.mrf.mxu0 }
 0x286   : > { %v738_v63 = vadd.f32 %v737_v55, %v656_v61 }
 0x293   : > { %v2321_v56 = vpop.f32.mrf.mxu1 }
 0x295   : > { %v821_v57 = vpop.f32.mrf.mxu1 }
 0x296   : > { %2324 = vmatprep.mubr.msk.f32.mxu0 %vm583_vm3, %v821_v57 }
 0x297   : > { %2325 = vmatmul.mubr.msk.f32.vlgmr.msra.gmra.mxu0 %vm583_vm3, %v2321_v56 }
 0x298   : > { %2328 = vmatpush3.msra.mxu0 %v2699_v26  ;;  %2343 = vmatprep.mubr.msk.f32.mxu0 %vm414_vm2, %v2053_v58 }
 0x299   : > { %2329 = vmatprep.subr.mxu0 %v2701_v29 }
 0x29a   : > { %2330 = vmatpush3.msra.mxu0 %v2701_v29 }
 0x29b   : > { %2331 = vmatprep.subr.mxu0 %v2707_v31 }
 0x29c   : > { %2332 = vmatpush3.msra.mxu0 %v2707_v31 }
 0x29d   : > { %2333 = vmatprep.subr.mxu0 %v2713_v33 }
 0x29e   : > { %2334 = vmatpush3.msra.mxu0 %v2713_v33 }
 0x29f   : > { %2335 = vmatprep.subr.mxu0 %v2719_v35 }
 0x2a0   : > { %2336 = vmatpush3.msra.mxu0 %v2719_v35 }
 0x2a1   : > { %2337 = vmatprep.subr.mxu0 %v2725_v37 }
 0x2a2   : > { %2338 = vmatpush3.msra.mxu0 %v2725_v37 }
 0x2a3   : > { %2339 = vmatprep.subr.mxu0 %v2731_v38 }
 0x2a4   : > { %2340 = vmatpush3.msra.mxu0 %v2731_v38 }
 0x2a5   : > { %2341 = vmatprep.subr.mxu0 %v2737_v39 }
 0x2a6   : > { %2342 = vmatpush3.msra.mxu0 %v2737_v39 }
 0x2a7   : > { %2344 = vmatmul.mubr.msk.f32.vlgmr.msra.gmra.mxu0 %vm414_vm2, %v2054_v59  ;;  %2370 = vmatprep.subr.mxu0 %v2064_v60 }
 0x2a8   : > { %2371 = vmatpush3.msra.mxu0 %v2064_v60 }
 0x2a9   : > { %2375 = vmatprep.subr.mxu0 %v2699_v26 }
 0x357   : > { %v2326_v62 = vpop.f32.mrf.mxu0 }
 0x358   : > { %v914_v0 = vadd.f32 %v2326_v62, %v743_v54 }
 0x359   : > { %v904_v1 = vpop.f32.mrf.mxu0 }
 0x35a   : > { %v913_v2 = vadd.f32 %v904_v1, %v738_v63 }
 0x367   : > { %v2345_v3 = vpop.f32.mrf.mxu0 }
 0x369   : > { %v990_v4 = vpop.f32.mrf.mxu0 }
 0x36a   : > { %2348 = vmatprep.mubr.msk.f32.mxu1 %vm583_vm3, %v990_v4 }
 0x36b   : > { %2349 = vmatmul.mubr.msk.f32.vlgmr.msra.gmra.mxu1 %vm583_vm3, %v2345_v3 }
 0x36c   : > { %2352 = vmatpush3.msra.mxu1 %v2699_v26  ;;  %2367 = vmatprep.mubr.msk.f32.mxu1 %vm414_vm2, %v2060_v5 }
 0x36d   : > { %2353 = vmatprep.subr.mxu1 %v2701_v29 }
 0x36e   : > { %2354 = vmatpush3.msra.mxu1 %v2701_v29 }
 0x36f   : > { %2355 = vmatprep.subr.mxu1 %v2707_v31 }
 0x370   : > { %2356 = vmatpush3.msra.mxu1 %v2707_v31 }
 0x371   : > { %2357 = vmatprep.subr.mxu1 %v2713_v33 }
 0x372   : > { %2358 = vmatpush3.msra.mxu1 %v2713_v33 }
 0x373   : > { %2359 = vmatprep.subr.mxu1 %v2719_v35 }
 0x374   : > { %2360 = vmatpush3.msra.mxu1 %v2719_v35 }
 0x375   : > { %2361 = vmatprep.subr.mxu1 %v2725_v37 }
 0x376   : > { %2362 = vmatpush3.msra.mxu1 %v2725_v37 }
 0x377   : > { %2363 = vmatprep.subr.mxu1 %v2731_v38 }
 0x378   : > { %2364 = vmatpush3.msra.mxu1 %v2731_v38 }
 0x379   : > { %2365 = vmatprep.subr.mxu1 %v2737_v39 }
 0x37a   : > { %2366 = vmatpush3.msra.mxu1 %v2737_v39 }
 0x37b   : > { %2368 = vmatmul.mubr.msk.f32.vlgmr.msra.gmra.mxu1 %vm414_vm2, %v2061_v6  ;;  %2394 = vmatprep.subr.mxu1 %v2071_v7 }
 0x37c   : > { %2395 = vmatpush3.msra.mxu1 %v2071_v7 }
 0x37d   : > { %2399 = vmatprep.subr.mxu1 %v2699_v26 }
 0x42b   : > { %v2350_v8 = vpop.f32.mrf.mxu1 }
 0x42c   : > { %v1083_v9 = vadd.f32 %v2350_v8, %v914_v0 }
 0x42d   : > { %v1073_v10 = vpop.f32.mrf.mxu1 }
 0x42e   : > { %v1082_v11 = vadd.f32 %v1073_v10, %v913_v2 }
 0x43b   : > { %v2369_v12 = vpop.f32.mrf.mxu1 }
 0x43d   : > { %v1159_v13 = vpop.f32.mrf.mxu1 }
 0x43e   : > { %2372 = vmatprep.mubr.msk.f32.mxu0 %vm583_vm3, %v1159_v13 }
 0x43f   : > { %2373 = vmatmul.mubr.msk.f32.vlgmr.msra.gmra.mxu0 %vm583_vm3, %v2369_v12 }
 0x440   : > { %2376 = vmatpush3.msra.mxu0 %v2699_v26  ;;  %2391 = vmatprep.mubr.msk.f32.mxu0 %vm414_vm2, %v2067_v14 }
 0x441   : > { %2377 = vmatprep.subr.mxu0 %v2701_v29 }
 0x442   : > { %2378 = vmatpush3.msra.mxu0 %v2701_v29 }
 0x443   : > { %2379 = vmatprep.subr.mxu0 %v2707_v31 }
 0x444   : > { %2380 = vmatpush3.msra.mxu0 %v2707_v31 }
 0x445   : > { %2381 = vmatprep.subr.mxu0 %v2713_v33 }
 0x446   : > { %2382 = vmatpush3.msra.mxu0 %v2713_v33 }
 0x447   : > { %2383 = vmatprep.subr.mxu0 %v2719_v35 }
 0x448   : > { %2384 = vmatpush3.msra.mxu0 %v2719_v35 }
 0x449   : > { %2385 = vmatprep.subr.mxu0 %v2725_v37 }
 0x44a   : > { %2386 = vmatpush3.msra.mxu0 %v2725_v37 }
 0x44b   : > { %2387 = vmatprep.subr.mxu0 %v2731_v38 }
 0x44c   : > { %2388 = vmatpush3.msra.mxu0 %v2731_v38 }
 0x44d   : > { %2389 = vmatprep.subr.mxu0 %v2737_v39 }
 0x44e   : > { %2390 = vmatpush3.msra.mxu0 %v2737_v39 }
 0x44f   : > { %2392 = vmatmul.mubr.msk.f32.vlgmr.msra.gmra.mxu0 %vm414_vm2, %v2068_v15  ;;  %2418 = vmatprep.subr.mxu0 %v2078_v16 }
 0x450   : > { %2419 = vmatpush3.msra.mxu0 %v2078_v16 }
 0x451   : > { %2423 = vmatprep.subr.mxu0 %v2699_v26 }
 0x4ff   : > { %v2374_v17 = vpop.f32.mrf.mxu0 }
 0x500   : > { %v1252_v18 = vadd.f32 %v2374_v17, %v1083_v9 }
 0x501   : > { %v1242_v19 = vpop.f32.mrf.mxu0 }
 0x502   : > { %v1251_v20 = vadd.f32 %v1242_v19, %v1082_v11 }
 0x50f   : > { %v2393_v21 = vpop.f32.mrf.mxu0 }
 0x511   : > { %v1328_v22 = vpop.f32.mrf.mxu0 }
 0x512   : > { %2396 = vmatprep.mubr.msk.f32.mxu1 %vm583_vm3, %v1328_v22 }
 0x513   : > { %2397 = vmatmul.mubr.msk.f32.vlgmr.msra.gmra.mxu1 %vm583_vm3, %v2393_v21 }
 0x514   : > { %2400 = vmatpush3.msra.mxu1 %v2699_v26  ;;  %2415 = vmatprep.mubr.msk.f32.mxu1 %vm414_vm2, %v2074_v23 }
 0x515   : > { %2401 = vmatprep.subr.mxu1 %v2701_v29 }
 0x516   : > { %2402 = vmatpush3.msra.mxu1 %v2701_v29 }
 0x517   : > { %2403 = vmatprep.subr.mxu1 %v2707_v31 }
 0x518   : > { %2404 = vmatpush3.msra.mxu1 %v2707_v31 }
 0x519   : > { %2405 = vmatprep.subr.mxu1 %v2713_v33 }
 0x51a   : > { %2406 = vmatpush3.msra.mxu1 %v2713_v33 }
 0x51b   : > { %2407 = vmatprep.subr.mxu1 %v2719_v35 }
 0x51c   : > { %2408 = vmatpush3.msra.mxu1 %v2719_v35 }
 0x51d   : > { %2409 = vmatprep.subr.mxu1 %v2725_v37 }
 0x51e   : > { %2410 = vmatpush3.msra.mxu1 %v2725_v37 }
 0x51f   : > { %2411 = vmatprep.subr.mxu1 %v2731_v38 }
 0x520   : > { %2412 = vmatpush3.msra.mxu1 %v2731_v38 }
 0x521   : > { %2413 = vmatprep.subr.mxu1 %v2737_v39 }
 0x522   : > { %2414 = vmatpush3.msra.mxu1 %v2737_v39 }
 0x523   : > { %2416 = vmatmul.mubr.msk.f32.vlgmr.msra.gmra.mxu1 %vm414_vm2, %v2075_v24  ;;  %2442 = vmatprep.subr.mxu1 %v2085_v25 }
 0x524   : > { %2443 = vmatpush3.msra.mxu1 %v2085_v25 }
 0x525   : > { %2447 = vmatprep.subr.mxu1 %v2699_v26 }
 0x5d3   : > { %v2398_v27 = vpop.f32.mrf.mxu1 }
 0x5d4   : > { %v1421_v28 = vadd.f32 %v2398_v27, %v1252_v18 }
 0x5d5   : > { %v1411_v30 = vpop.f32.mrf.mxu1 }
 0x5d6   : > { %v1420_v32 = vadd.f32 %v1411_v30, %v1251_v20 }
 0x5e3   : > { %v2417_v34 = vpop.f32.mrf.mxu1 }
 0x5e5   : > { %v1497_v36 = vpop.f32.mrf.mxu1 }
 0x5e6   : > { %2420 = vmatprep.mubr.msk.f32.mxu0 %vm583_vm3, %v1497_v36 }
 0x5e7   : > { %2421 = vmatmul.mubr.msk.f32.vlgmr.msra.gmra.mxu0 %vm583_vm3, %v2417_v34 }
 0x5e8   : > { %2424 = vmatpush3.msra.mxu0 %v2699_v26  ;;  %2439 = vmatprep.mubr.msk.f32.mxu0 %vm414_vm2, %v2081_v40 }
 0x5e9   : > { %2425 = vmatprep.subr.mxu0 %v2701_v29 }
 0x5ea   : > { %2426 = vmatpush3.msra.mxu0 %v2701_v29 }
 0x5eb   : > { %2427 = vmatprep.subr.mxu0 %v2707_v31 }
 0x5ec   : > { %2428 = vmatpush3.msra.mxu0 %v2707_v31 }
 0x5ed   : > { %2429 = vmatprep.subr.mxu0 %v2713_v33 }
 0x5ee   : > { %2430 = vmatpush3.msra.mxu0 %v2713_v33 }
 0x5ef   : > { %2431 = vmatprep.subr.mxu0 %v2719_v35 }
 0x5f0   : > { %2432 = vmatpush3.msra.mxu0 %v2719_v35 }
 0x5f1   : > { %2433 = vmatprep.subr.mxu0 %v2725_v37 }
 0x5f2   : > { %2434 = vmatpush3.msra.mxu0 %v2725_v37 }
 0x5f3   : > { %2435 = vmatprep.subr.mxu0 %v2731_v38 }
 0x5f4   : > { %2436 = vmatpush3.msra.mxu0 %v2731_v38 }
 0x5f5   : > { %2437 = vmatprep.subr.mxu0 %v2737_v39 }
 0x5f6   : > { %2438 = vmatpush3.msra.mxu0 %v2737_v39 }
 0x5f7   : > { %2440 = vmatmul.mubr.msk.f32.vlgmr.msra.gmra.mxu0 %vm414_vm2, %v2082_v41 }
 0x6a7   : > { %v2422_v42 = vpop.f32.mrf.mxu0 }
 0x6a8   : > { %v1590_v43 = vadd.f32 %v2422_v42, %v1421_v28 }
 0x6a9   : > { %v1580_v44 = vpop.f32.mrf.mxu0 }
 0x6aa   : > { %v1589_v45 = vadd.f32 %v1580_v44, %v1420_v32 }
 0x6b7   : > { %v2441_v46 = vpop.f32.mrf.mxu0 }
 0x6b9   : > { %v1666_v47 = vpop.f32.mrf.mxu0 }
 0x6ba   : > { %2444 = vmatprep.mubr.msk.f32.mxu1 %vm583_vm3, %v1666_v47 }
 0x6bb   : > { %2445 = vmatmul.mubr.msk.f32.vlgmr.msra.gmra.mxu1 %vm583_vm3, %v2441_v46 }
 0x6bc   : > { %2448 = vmatpush3.msra.mxu1 %v2699_v26  ;;  %2463 = vmatprep.mubr.msk.f32.mxu1 %vm414_vm2, %v2088_v48  ;;  %v2089_v26 = vld [vmem:[%s3023_s3 + $0x88] sm:$0xff] }
 0x6bd   : > { %2449 = vmatprep.subr.mxu1 %v2701_v29 }
 0x6be   : > { %2450 = vmatpush3.msra.mxu1 %v2701_v29  ;;  %v2092_v29 = vld [vmem:[%s3024_s4 + $0x40] sm:$0xff] }
 0x6bf   : > { %2451 = vmatprep.subr.mxu1 %v2707_v31  ;;  %2466 = vmatprep.subr.mxu0 %v2092_v29 }
 0x6c0   : > { %2452 = vmatpush3.msra.mxu1 %v2707_v31  ;;  %2467 = vmatpush3.msra.mxu0 %v2092_v29 }
 0x6c1   : > { %2453 = vmatprep.subr.mxu1 %v2713_v33 }
 0x6c2   : > { %2454 = vmatpush3.msra.mxu1 %v2713_v33 }
 0x6c3   : > { %2455 = vmatprep.subr.mxu1 %v2719_v35 }
 0x6c4   : > { %2456 = vmatpush3.msra.mxu1 %v2719_v35 }
 0x6c5   : > { %2457 = vmatprep.subr.mxu1 %v2725_v37 }
 0x6c6   : > { %2458 = vmatpush3.msra.mxu1 %v2725_v37 }
 0x6c7   : > { %2459 = vmatprep.subr.mxu1 %v2731_v38 }
 0x6c8   : > { %2460 = vmatpush3.msra.mxu1 %v2731_v38 }
 0x6c9   : > { %2461 = vmatprep.subr.mxu1 %v2737_v39 }
 0x6ca   : > { %2462 = vmatpush3.msra.mxu1 %v2737_v39 }
 0x6cb   : > { %2464 = vmatmul.mubr.msk.f32.vlgmr.msra.gmra.mxu1 %vm414_vm2, %v2089_v26 }
 0x77b   : > { %v2446_v31 = vpop.f32.mrf.mxu1 }
 0x77c   : > { %v1759_v33 = vadd.f32 %v2446_v31, %v1590_v43 }
 0x77d   : > { %v1749_v35 = vpop.f32.mrf.mxu1 }
 0x77e   : > { %v1758_v37 = vadd.f32 %v1749_v35, %v1589_v45 }
 0x78b   : > { %v2465_v38 = vpop.f32.mrf.mxu1 }
 0x78d   : > { %v1835_v49 = vpop.f32.mrf.mxu1 }
 0x78e   : > { %2468 = vmatprep.mubr.msk.f32.mxu0 %vm583_vm3, %v1835_v49 }
 0x78f   : > { %2469 = vmatmul.mubr.msk.f32.vlgmr.msra.gmra.mxu0 %vm583_vm3, %v2465_v38 }
 0x84f   : > { %v2470_v39 = vpop.f32.mrf.mxu0 }
 0x850   : > { %v1928_v51 = vadd.f32 %v2470_v39, %v1759_v33 }
 0x851   : > { %v1918_v52 = vpop.f32.mrf.mxu0 }
 0x852   : > { %v1937_v53 = vadd.f32 %v2095_v50, %v1928_v51  ;;  %v1927_v54 = vadd.f32 %v1918_v52, %v1758_v37 }
 0x854   : > { %v1939_v55 = vmax.f32 %v1937_v53, 0.0  ;;  %v1936_v56 = vadd.f32 %v2095_v50, %v1927_v54 }
 0x856   : > { %1941 = vst [vmem:[%s244_s9 + $0x8] sm:$0xff] %v1939_v55  ;;  %v1938_v57 = vmax.f32 %v1936_v56, 0.0 }
 0x858   : > { %1940 = vst [vmem:[%s244_s9] sm:$0xff] %v1938_v57 }
 0x859   : > { %2525 = shalt.err (!%p2522_p3)
}
 0x85a   : > { %s2526_s19 = scalar_lea.hbm %s2978_s14, 256  ;;  %s2530_s28 = scalar_lea.hbm %s3026_s6, 512 }
 0x85b   : > { %p2527_p4 = scmp.ne.s32.totalorder %s2978_s14, %s2526_s19  ;;  %p2531_p9 = scmp.lt.s32.totalorder %s2978_s14, %s3026_s6 }
 0x85c   : > { %p2532_p10 = scmp.lt.s32.totalorder %s2530_s28, %s2526_s19 }
 0x85d   : > { %p2528_p7 = pnand %p2527_p4, %p2650_p5 }
 0x85e   : > { %p2533_p11 = por %p2532_p10, %p2531_p9 }
 0x85f   : > { %p2529_p8 = pneg %p2528_p7 }
 0x861   : > { %p2534_p12 = pnand %p2533_p11, %p2529_p8 }
 0x863   : > { %2537 = shalt.err (!%p2534_p12)
}
 0x864   : > { %s2575_s11 = smov 128   ;;  %s2576_s12 = smov 8  }
 0x865   : > { %2471 = dma.vmem_to_hbm [thread:$0]  (%p2650_p5), %s2973_s10, 256, %s2978_s14, %s2980_s15, %s2575_s11, %s2575_s11, %s2576_s12  }
 0x866 PF: > { %p2477_p13 = scmp.ge.s32.totalorder %s2572_s24, 2  ;;  %s1971_s13 = sand.u32 1, %s2560_s21  }
 0x867   : > { %s1972_s16 = scalar_lea.sflag [#allocation3], %s1971_s13 }
 0x868   : > { %p2474_p0 = pnand %p2477_p13, %p2654_p6 }
 0x86a   : > { %p2475_p1 = pneg %p2474_p0 }
 0x86c   : > { %2555 = dma.done.wait (%p2475_p1), %s1972_s16, 256  }
 0x86d   : > { %2557 = vsyncadd (%p2475_p1), %s1972_s16, 4294967040  ;;  %p16_p2 = scmp.ge.s32.totalorder %s2637_s27, 4   ;;  %s3029_s21 = smov %s2564_s22 }
 0x86e   : > { %s3030_s22 = smov %s2568_s23  ;;  %s3031_s23 = smov %s2648_s30 }
 0x86f   : > { %s3032_s24 = smov %s2637_s27  ;;  %18 = sbr.rel (!%p16_p2) target bundleno = 3 (0x3), region = 95 }
 0x874   :  { %1977 = vsyncpa [#allocation3], 1 }
 0x875   :  { %1979 = vsyncpa [#allocation3 + $0x1], 1 }

</bundles_post_ra>
